<compile_context>
chip_gen: v5e
topology: v5e:2x2
jax: 0.10.0
libtpu: 0.0.40
codegen_flags: <defaults>
</compile_context>

<pallas_src>
import functools

import jax
import jax.numpy as jnp
from jax.experimental import pallas as pl
from jax.experimental.pallas import tpu as pltpu


# ----------------------------------------------------------------------------
# Model hyper-parameters (synthetic, deterministic)
# ----------------------------------------------------------------------------
C_DIM = 32          # latent code size
HIDDEN = 128        # decoder MLP hidden width
N_STEPS = 16        # ray-marching samples per ray
DEPTH_RANGE = (2.5, 6.75)


# ----------------------------------------------------------------------------
# Small helpers
# ----------------------------------------------------------------------------
def _full_spec(arr):
    zero = (0,) * arr.ndim
    return pl.BlockSpec(arr.shape, lambda i, z=zero: z)


def _row_to_col(row):
    """(1, n) -> (n, 1) via iota-select + lane reduce (avoids relayout reshapes)."""
    n = row.shape[1]
    r_idx = jax.lax.broadcasted_iota(jnp.int32, (n, n), 0)
    c_idx = jax.lax.broadcasted_iota(jnp.int32, (n, n), 1)
    return jnp.sum(jnp.where(r_idx == c_idx, row, 0.0), axis=1, keepdims=True)


# ----------------------------------------------------------------------------
# Kernel 1: encoder (full-array, no grid)
# ----------------------------------------------------------------------------
def _encoder_kernel(x_ref, w_ref, b_ref, out_ref):
    out_ref[...] = (
        jnp.dot(x_ref[...], w_ref[...], preferred_element_type=jnp.float32)
        + b_ref[...]
    )


def encode_inputs(inputs, params):
    b = inputs.shape[0]
    x_flat = inputs.reshape(b, -1)  # NCHW flattened row-major (matches torch .view)
    return pl.pallas_call(
        _encoder_kernel,
        out_shape=jax.ShapeDtypeStruct((b, C_DIM), jnp.float32),
    )(x_flat, params["w_enc"], params["b_enc"])


# ----------------------------------------------------------------------------
# Kernel 2: fused occupancy-logit decoder (occupancy / freespace / mask points)
# ----------------------------------------------------------------------------
def _decode_logits_kernel(pts_ref, c_ref, wp_ref, wc_ref, b0_ref, w1_ref, b1_ref,
                          wocc_ref, bocc_ref, out_ref):
    pts = pts_ref[0]          # (M, 3)
    cfeat = c_ref[0]          # (1, c_dim)

    # Hoisted loop-invariant latent bias: c @ Wc + b0
    cbias = jnp.dot(cfeat, wc_ref[...], preferred_element_type=jnp.float32) + b0_ref[...]
    h1 = jnp.maximum(
        jnp.dot(pts, wp_ref[...], preferred_element_type=jnp.float32) + cbias, 0.0)
    h2 = jnp.maximum(
        jnp.dot(h1, w1_ref[...], preferred_element_type=jnp.float32) + b1_ref[...], 0.0)

    # Transposed occupancy head: logits for all M points land lane-dense as (1, M).
    logits = (jnp.dot(wocc_ref[...], h2.T, preferred_element_type=jnp.float32)
              + bocc_ref[...])
    out_ref[...] = logits


def decode_logits(points, c, params):
    """points: (B, M, 3), c: (B, c_dim) -> logits (B, M) (lane-dense)."""
    b, m, _ = points.shape
    c3 = c[:, None, :]  # (B, 1, c_dim)
    weights = (params["wp"], params["wc"], params["b0"], params["w1"],
               params["b1"], params["w_occ"], params["b_occ"])
    in_specs = ([pl.BlockSpec((1, m, 3), lambda i: (i, 0, 0)),
                 pl.BlockSpec((1, 1, C_DIM), lambda i: (i, 0, 0))]
                + [_full_spec(w) for w in weights])
    return pl.pallas_call(
        _decode_logits_kernel,
        grid=(b,),
        in_specs=in_specs,
        out_specs=pl.BlockSpec((1, m), lambda i: (i, 0)),
        out_shape=jax.ShapeDtypeStruct((b, m), jnp.float32),
        compiler_params=pltpu.CompilerParams(dimension_semantics=("parallel",)),
    )(points, c3, *weights)


# ----------------------------------------------------------------------------
# Kernel 3: fused ray marching (DepthModule) + colour decode at hit points
# ----------------------------------------------------------------------------
def _march_color_kernel(o_ref, r_ref, c_ref, wp_ref, wc_ref, b0_ref, w1_ref,
                        b1_ref, wocc_ref, bocc_ref, wtex_ref, btex_ref,
                        d_ref, pw_ref, rgb_ref, h1_ref,
                        *, depth_min, depth_max, n_steps):
    o = o_ref[0]              # (N, 3) camera centers
    r = r_ref[0]              # (N, 3) rays
    cfeat = c_ref[0]          # (1, c_dim)
    n = o.shape[0]
    step = (depth_max - depth_min) / (n_steps - 1)

    w1 = w1_ref[...]
    b1 = b1_ref[...]
    wocc = wocc_ref[...]      # (1, HIDDEN)
    bocc = bocc_ref[...]      # (1, 1)

    # Hoisted loop-invariant latent bias: c @ Wc + b0  (computed once)
    cbias = jnp.dot(cfeat, wc_ref[...], preferred_element_type=jnp.float32) + b0_ref[...]

    # First layer decomposed:  (o + d*r) @ Wp = o@Wp + d*(r@Wp)  -> two small matmuls.
    o_wp = jnp.dot(o, wp_ref[...], preferred_element_type=jnp.float32)   # (N, H)
    r_wp = jnp.dot(r, wp_ref[...], preferred_element_type=jnp.float32)   # (N, H)

    # Step-batched first-layer activations stacked into a (n_steps*N, H) VMEM slab.
    for s in range(n_steps):
        ds = depth_min + s * step
        h1_ref[s * n:(s + 1) * n, :] = jnp.maximum(o_wp + ds * r_wp + cbias, 0.0)

    # One big second-layer matmul for all depth samples (M = n_steps*N).
    h2_all = jnp.maximum(
        jnp.dot(h1_ref[...], w1, preferred_element_type=jnp.float32) + b1, 0.0)

    # Occupancy head, transposed so per-sample logits land lane-dense: (1, n_steps*N).
    f_row = jnp.dot(wocc, h2_all.T, preferred_element_type=jnp.float32) + bocc

    # First free->occupied crossing per ray; state kept lane-dense as (1, N).
    f_prev = f_row[:, 0:n]
    occ0 = f_prev >= 0.0
    found = jnp.zeros((1, n), jnp.bool_)
    zeros = jnp.zeros((1, n), jnp.float32)
    f_lo, f_hi, d_lo, d_hi = zeros, zeros, zeros, zeros
    for s in range(1, n_steps):
        f_cur = f_row[:, s * n:(s + 1) * n]
        new_cross = jnp.logical_and(
            jnp.logical_not(found),
            jnp.logical_and(f_prev < 0.0, f_cur >= 0.0))
        f_lo = jnp.where(new_cross, f_prev, f_lo)
        f_hi = jnp.where(new_cross, f_cur, f_hi)
        d_lo = jnp.where(new_cross, depth_min + (s - 1) * step, d_lo)
        d_hi = jnp.where(new_cross, depth_min + s * step, d_hi)
        found = jnp.logical_or(found, new_cross)
        f_prev = f_cur

    # Secant refinement (single analytic step).
    # TODO(synk): reference DepthModule iterates the secant step (~8x) with
    # re-evaluation of the decoder; a single step is used here.
    denom = f_hi - f_lo
    safe = jnp.where(denom == 0.0, 1.0, denom)
    d_secant = d_lo - f_lo * (d_hi - d_lo) * pl.reciprocal(safe, approx=True)
    d_i = jnp.where(occ0, 0.0, jnp.where(found, d_secant, jnp.inf))      # (1, N)
    d_ref[...] = d_i

    # Fused colour decode at the (masked) hit points, reusing o@Wp / r@Wp / cbias.
    hit = jnp.logical_and(found, jnp.logical_not(occ0))
    d_hat = jnp.where(hit, d_secant, 0.0)                                # (1, N)
    d_col = _row_to_col(d_hat)                                           # (N, 1)
    p_w = o + d_col * r                                                  # (N, 3)
    h1h = jnp.maximum(o_wp + d_col * r_wp + cbias, 0.0)
    h2h = jnp.maximum(jnp.dot(h1h, w1, preferred_element_type=jnp.float32) + b1, 0.0)
    rgb = jax.nn.sigmoid(
        jnp.dot(h2h, wtex_ref[...], preferred_element_type=jnp.float32) + btex_ref[...])
    pw_ref[0] = p_w
    rgb_ref[0] = rgb


def march_and_color(c_world, ray, c, params, depth_range=DEPTH_RANGE,
                    n_steps=N_STEPS):
    """Returns d_i (B, N), p_world_hat (B, N, 3), rgb (B, N, 3)."""
    b, n, _ = c_world.shape
    c3 = c[:, None, :]
    weights = (params["wp"], params["wc"], params["b0"], params["w1"],
               params["b1"], params["w_occ"], params["b_occ"],
               params["w_tex"], params["b_tex"])
    in_specs = ([pl.BlockSpec((1, n, 3), lambda i: (i, 0, 0)),
                 pl.BlockSpec((1, n, 3), lambda i: (i, 0, 0)),
                 pl.BlockSpec((1, 1, C_DIM), lambda i: (i, 0, 0))]
                + [_full_spec(w) for w in weights])
    out_specs = (pl.BlockSpec((1, n), lambda i: (i, 0)),
                 pl.BlockSpec((1, n, 3), lambda i: (i, 0, 0)),
                 pl.BlockSpec((1, n, 3), lambda i: (i, 0, 0)))
    out_shape = (jax.ShapeDtypeStruct((b, n), jnp.float32),
                 jax.ShapeDtypeStruct((b, n, 3), jnp.float32),
                 jax.ShapeDtypeStruct((b, n, 3), jnp.float32))
    kernel = functools.partial(
        _march_color_kernel,
        depth_min=float(depth_range[0]),
        depth_max=float(depth_range[1]),
        n_steps=int(n_steps),
    )
    return pl.pallas_call(
        kernel,
        grid=(b,),
        in_specs=in_specs,
        out_specs=out_specs,
        out_shape=out_shape,
        scratch_shapes=[pltpu.VMEM((int(n_steps) * n, HIDDEN), jnp.float32)],
        compiler_params=pltpu.CompilerParams(dimension_semantics=("parallel",)),
    )(c_world, ray, c3, *weights)


# ----------------------------------------------------------------------------
# Plain-JAX glue matching the PyTorch forward structure
# ----------------------------------------------------------------------------
def points_to_world(p, K, R, C, origin, scale):
    """Unproject pixels (B,N,2) to world points at unit camera depth."""
    b, n, _ = p.shape
    ones = jnp.ones((b, n, 1), p.dtype)
    p_hom = jnp.concatenate([p, ones], axis=-1)                     # (B,N,3)
    k_inv = jnp.linalg.inv(K)
    d_cam = jnp.einsum("bij,bnj->bni", k_inv, p_hom)
    d_world = jnp.einsum("bji,bnj->bni", R, d_cam)                  # R^T @ d
    c_vec = C[:, 0, :, 0][:, None, :]                               # (B,1,3)
    return c_vec + d_world * scale + origin


def pixels_to_world(p, K, R, C, origin, scale, c, params,
                    depth_range=DEPTH_RANGE):
    b, n, _ = p.shape
    p_world0 = points_to_world(p, K, R, C, origin, scale)
    # c_world = C.squeeze(1).permute(0,2,1).repeat(1, N, 1)
    c_world = jnp.broadcast_to(jnp.transpose(C[:, 0], (0, 2, 1)), (b, n, 3))
    ray = p_world0 - c_world
    d_i, p_world_hat, rgb_pred = march_and_color(
        c_world, ray, c, params, depth_range=depth_range)
    mask_zero_occupied = d_i == 0
    mask_pred = jnp.isfinite(d_i)                 # get_mask: finite & not-nan
    d_hat = jnp.where(mask_pred, d_i, 0.0)
    d_hat = jnp.where(mask_zero_occupied, 0.0, d_hat)
    return p_world_hat, rgb_pred, mask_pred, mask_zero_occupied, d_hat


def dvr_forward(params, p, p_occupancy, p_freespace, p_mask, inputs,
                K, R, C, origin, scale, depth_range=DEPTH_RANGE):
    c = encode_inputs(inputs, params)
    p_world, rgb_pred, mask_pred, mask_zero_occupied, d_hat = pixels_to_world(
        p, K, R, C, origin, scale, c, params, depth_range=depth_range)
    # Fuse the three occupancy-logit decodes into one pallas_call.
    n_pts = p_occupancy.shape[1]
    pts_all = jnp.concatenate([p_occupancy, p_freespace, p_mask], axis=1)
    logits_all = decode_logits(pts_all, c, params)                  # (B, 3*n_pts)
    logits_occupancy = logits_all[:, :n_pts]
    logits_freespace = logits_all[:, n_pts:2 * n_pts]
    logits_mask = logits_all[:, 2 * n_pts:]
    # TODO(synk): correspondence branch (p_corr_1 / p_corr_2) and
    # get_normals/get_central_difference are not exercised by this forward path.
    return (p_world, rgb_pred, logits_occupancy, logits_freespace, logits_mask,
            mask_pred, d_hat, None, None, None, None, None, None)


# ----------------------------------------------------------------------------
# Deterministic parameter init
# ----------------------------------------------------------------------------
def init_params(h_img, w_img):
    key = jax.random.PRNGKey(1)
    ks = jax.random.split(key, 8)
    d_in = 3 * h_img * w_img
    f32 = jnp.float32

    def nrm(k, shape, fan_in):
        return (jax.random.normal(k, shape, f32) / jnp.sqrt(jnp.float32(fan_in)))

    return {
        "w_enc": nrm(ks[0], (d_in, C_DIM), d_in),
        "b_enc": jnp.zeros((1, C_DIM), f32),
        "wp": nrm(ks[1], (3, HIDDEN), 3),
        "wc": nrm(ks[2], (C_DIM, HIDDEN), C_DIM),
        "b0": jnp.zeros((1, HIDDEN), f32),
        "w1": nrm(ks[3], (HIDDEN, HIDDEN), HIDDEN),
        "b1": jnp.zeros((1, HIDDEN), f32),
        "w_occ": nrm(ks[4], (1, HIDDEN), HIDDEN),     # stored as a row vector
        "b_occ": jnp.zeros((1, 1), f32),
        "w_tex": nrm(ks[5], (HIDDEN, 3), HIDDEN),
        "b_tex": jnp.zeros((1, 3), f32),
    }


# ----------------------------------------------------------------------------
# Main
# ----------------------------------------------------------------------------
if __name__ == "__main__":
    B, H_IMG, W_IMG = 2, 16, 16
    N_PIX = 128
    N_PTS = 128

    params = init_params(H_IMG, W_IMG)

    key = jax.random.PRNGKey(0)
    k = jax.random.split(key, 8)
    p = jax.random.uniform(k[0], (B, N_PIX, 2), jnp.float32, -1.0, 1.0)
    p_occupancy = jax.random.uniform(k[1], (B, N_PTS, 3), jnp.float32, -0.5, 0.5)
    p_freespace = jax.random.uniform(k[2], (B, N_PTS, 3), jnp.float32, -0.5, 0.5)
    p_mask = jax.random.uniform(k[3], (B, N_PTS, 3), jnp.float32, -0.5, 0.5)
    inputs = jax.random.normal(k[4], (B, 3, H_IMG, W_IMG), jnp.float32)

    focal = 2.0
    K = jnp.broadcast_to(
        jnp.array([[focal, 0.0, 0.0], [0.0, focal, 0.0], [0.0, 0.0, 1.0]],
                  jnp.float32), (B, 3, 3))
    R = jnp.broadcast_to(jnp.eye(3, dtype=jnp.float32), (B, 3, 3))
    C = jnp.broadcast_to(
        jnp.array([0.0, 0.0, -4.0], jnp.float32).reshape(1, 1, 3, 1),
        (B, 1, 3, 1))
    origin = jnp.zeros((B, 1, 3), jnp.float32)
    scale = jnp.ones((B, 1, 1), jnp.float32)

    outs = dvr_forward(params, p, p_occupancy, p_freespace, p_mask, inputs,
                       K, R, C, origin, scale)
    jax.block_until_ready([o for o in outs if o is not None])

    (p_world, rgb_pred, lo, lf, lm, mask_pred, d_hat, *_rest) = outs
    assert p_world.shape == (B, N_PIX, 3)
    assert rgb_pred.shape == (B, N_PIX, 3)
    assert lo.shape == (B, N_PTS) and lf.shape == (B, N_PTS) and lm.shape == (B, N_PTS)
    assert mask_pred.shape == (B, N_PIX) and d_hat.shape == (B, N_PIX)
    print("KERNEL_OK")
</pallas_src>

<mosaic_0001>
module attributes {stable_mosaic.version = 11 : i64} {
  func.func @_encoder_kernel(%arg0: memref<2x768xf32, #tpu.memory_space<vmem>>, %arg1: memref<768x32xf32, #tpu.memory_space<vmem>>, %arg2: memref<1x32xf32, #tpu.memory_space<vmem>>, %arg3: memref<2x32xf32, #tpu.memory_space<vmem>>) attributes {dimension_semantics = [], scalar_prefetch = 0 : i64, scratch_operands = 0 : i64, tpu.core_type = #tpu.core_type<tc>} {
    %c0 = arith.constant 0 : index
    %c0_0 = arith.constant 0 : index
    %0 = vector.load %arg0[%c0, %c0_0] : memref<2x768xf32, #tpu.memory_space<vmem>>, vector<2x768xf32>
    %c0_1 = arith.constant 0 : index
    %c0_2 = arith.constant 0 : index
    %1 = vector.load %arg1[%c0_1, %c0_2] : memref<768x32xf32, #tpu.memory_space<vmem>>, vector<768x32xf32>
    %cst = arith.constant dense<0.000000e+00> : vector<2x32xf32>
    %2 = tpu.matmul %0, %1, %cst {dimension_numbers = #tpu.dot_dimension_numbers<[1], [0], [0], [1], [0, 0, 1, 1], [], []>} : vector<2x768xf32>, vector<768x32xf32>, vector<2x32xf32> -> vector<2x32xf32>
    %c0_3 = arith.constant 0 : index
    %c0_4 = arith.constant 0 : index
    %3 = vector.load %arg2[%c0_3, %c0_4] : memref<1x32xf32, #tpu.memory_space<vmem>>, vector<1x32xf32>
    %4 = vector.broadcast %3 : vector<1x32xf32> to vector<2x32xf32>
    %5 = arith.addf %2, %4 : vector<2x32xf32>
    %c0_5 = arith.constant 0 : index
    %c0_6 = arith.constant 0 : index
    %6 = vector.load %arg3[%c0_5, %c0_6] : memref<2x32xf32, #tpu.memory_space<vmem>>, vector<2x32xf32>
    tpu.vector_store %arg3[%c0_5, %c0_6], %5 {strides = array<i32>} : memref<2x32xf32, #tpu.memory_space<vmem>>, vector<2x32xf32>,
    return
  }
}

</mosaic_0001>

<bundles_post_ra>
// kernel: tpu_custom_call.1
= control target key start
LH: loop header
LB: loop body
LE: loop exit
PB: predicated region body
PF: predicated region fallthrough
CT: control target
= control target key end

     0   :  { %s621_s0 = inlined_call_operand.vmem [shape: f32[2,768], index: 0, kind: input, shape index: {}]   ;;  %s622_s1 = inlined_call_operand.vmem [shape: f32[768,32], index: 1, kind: input, shape index: {}]   ;;  %s623_s2 = inlined_call_operand.vmem [shape: f32[1,32], index: 2, kind: input, shape index: {}]   ;;  %s624_s3 = inlined_call_operand.hbm [shape: f32[2,32], index: 3, kind: output, shape index: {}]  }
   0x1   :  { %v32_v0 = vld [vmem:[%s622_s1 + $0x78] sm:$0xff]  ;;  %v31_v1 = vld [vmem:[%s622_s1 + $0x70] sm:$0xff]  ;;  %v30_v4 = vld [vmem:[%s622_s1 + $0x68] sm:$0xff] }
   0x2   :  { %v48_v2 = vld [vmem:[%s622_s1 + $0xf8] sm:$0xff]  ;;  %134 = vmatpush.msra.mxu0 %v32_v0  ;;  %v47_v3 = vld [vmem:[%s622_s1 + $0xf0] sm:$0xff]  ;;  %v46_v5 = vld [vmem:[%s622_s1 + $0xe8] sm:$0xff] }
   0x3   :  { %154 = vmatpush.msra.mxu1 %v48_v2  ;;  %v29_v6 = vld [vmem:[%s622_s1 + $0x60] sm:$0xff]  ;;  %v28_v8 = vld [vmem:[%s622_s1 + $0x58] sm:$0xff]  ;;  %v27_v10 = vld [vmem:[%s622_s1 + $0x50] sm:$0xff] }
   0x4   :  { %135 = vmatpush.msra.mxu0 %v31_v1  ;;  %v45_v7 = vld [vmem:[%s622_s1 + $0xe0] sm:$0xff]  ;;  %v44_v9 = vld [vmem:[%s622_s1 + $0xd8] sm:$0xff]  ;;  %v43_v12 = vld [vmem:[%s622_s1 + $0xd0] sm:$0xff] }
   0x5   :  { %155 = vmatpush.msra.mxu1 %v47_v3  ;;  %v64_v11 = vld [vmem:[%s622_s1 + $0x178] sm:$0xff]  ;;  %v63_v13 = vld [vmem:[%s622_s1 + $0x170] sm:$0xff]  ;;  %v62_v15 = vld [vmem:[%s622_s1 + $0x168] sm:$0xff] }
   0x6   :  { %136 = vmatpush.msra.mxu0 %v30_v4  ;;  %174 = vmatpush.msra.mxu2 %v64_v11  ;;  %v80_v14 = vld [vmem:[%s622_s1 + $0x1f8] sm:$0xff]  ;;  %v79_v16 = vld [vmem:[%s622_s1 + $0x1f0] sm:$0xff]  ;;  %v26_v17 = vld [vmem:[%s622_s1 + $0x48] sm:$0xff] }
   0x7   :  { %156 = vmatpush.msra.mxu1 %v46_v5  ;;  %v42_v18 = vld [vmem:[%s622_s1 + $0xc8] sm:$0xff]  ;;  %194 = vmatpush.msra.mxu3 %v80_v14  ;;  %v61_v19 = vld [vmem:[%s622_s1 + $0x160] sm:$0xff]  ;;  %v60_v23 = vld [vmem:[%s622_s1 + $0x158] sm:$0xff] }
   0x8   :  { %137 = vmatpush.msra.mxu0 %v29_v6  ;;  %175 = vmatpush.msra.mxu2 %v63_v13  ;;  %v78_v20 = vld [vmem:[%s622_s1 + $0x1e8] sm:$0xff]  ;;  %v25_v21 = vld [vmem:[%s622_s1 + $0x40] sm:$0xff]  ;;  %v24_v25 = vld [vmem:[%s622_s1 + $0x38] sm:$0xff] }
   0x9   :  { %157 = vmatpush.msra.mxu1 %v45_v7  ;;  %v41_v22 = vld [vmem:[%s622_s1 + $0xc0] sm:$0xff]  ;;  %195 = vmatpush.msra.mxu3 %v79_v16  ;;  %v40_v26 = vld [vmem:[%s622_s1 + $0xb8] sm:$0xff]  ;;  %v59_v27 = vld [vmem:[%s622_s1 + $0x150] sm:$0xff] }
   0xa   :  { %138 = vmatpush.msra.mxu0 %v28_v8  ;;  %176 = vmatpush.msra.mxu2 %v62_v15  ;;  %v77_v24 = vld [vmem:[%s622_s1 + $0x1e0] sm:$0xff]  ;;  %v76_v28 = vld [vmem:[%s622_s1 + $0x1d8] sm:$0xff]  ;;  %v23_v29 = vld [vmem:[%s622_s1 + $0x30] sm:$0xff] }
   0xb   :  { %158 = vmatpush.msra.mxu1 %v44_v9  ;;  %196 = vmatpush.msra.mxu3 %v78_v20  ;;  %v39_v30 = vld [vmem:[%s622_s1 + $0xb0] sm:$0xff]  ;;  %v58_v31 = vld [vmem:[%s622_s1 + $0x148] sm:$0xff]  ;;  %v57_v35 = vld [vmem:[%s622_s1 + $0x140] sm:$0xff] }
   0xc   :  { %139 = vmatpush.msra.mxu0 %v27_v10  ;;  %177 = vmatpush.msra.mxu2 %v61_v19  ;;  %v75_v32 = vld [vmem:[%s622_s1 + $0x1d0] sm:$0xff]  ;;  %v22_v33 = vld [vmem:[%s622_s1 + $0x28] sm:$0xff]  ;;  %v21_v37 = vld [vmem:[%s622_s1 + $0x20] sm:$0xff] }
   0xd   :  { %159 = vmatpush.msra.mxu1 %v43_v12  ;;  %197 = vmatpush.msra.mxu3 %v77_v24  ;;  %v38_v34 = vld [vmem:[%s622_s1 + $0xa8] sm:$0xff]  ;;  %v37_v38 = vld [vmem:[%s622_s1 + $0xa0] sm:$0xff]  ;;  %v56_v39 = vld [vmem:[%s622_s1 + $0x138] sm:$0xff] }
   0xe   :  { %140 = vmatpush.msra.mxu0 %v26_v17  ;;  %178 = vmatpush.msra.mxu2 %v60_v23  ;;  %v74_v36 = vld [vmem:[%s622_s1 + $0x1c8] sm:$0xff]  ;;  %v73_v40 = vld [vmem:[%s622_s1 + $0x1c0] sm:$0xff]  ;;  %v20_v41 = vld [vmem:[%s622_s1 + $0x18] sm:$0xff] }
   0xf   :  { %160 = vmatpush.msra.mxu1 %v42_v18  ;;  %198 = vmatpush.msra.mxu3 %v76_v28  ;;  %v36_v42 = vld [vmem:[%s622_s1 + $0x98] sm:$0xff]  ;;  %v55_v43 = vld [vmem:[%s622_s1 + $0x130] sm:$0xff]  ;;  %v54_v47 = vld [vmem:[%s622_s1 + $0x128] sm:$0xff] }
  0x10   :  { %141 = vmatpush.msra.mxu0 %v25_v21  ;;  %179 = vmatpush.msra.mxu2 %v59_v27  ;;  %v72_v44 = vld [vmem:[%s622_s1 + $0x1b8] sm:$0xff]  ;;  %v19_v45 = vld [vmem:[%s622_s1 + $0x10] sm:$0xff]  ;;  %v18_v49 = vld [vmem:[%s622_s1 + $0x8] sm:$0xff] }
  0x11   :  { %161 = vmatpush.msra.mxu1 %v41_v22  ;;  %199 = vmatpush.msra.mxu3 %v75_v32  ;;  %v35_v46 = vld [vmem:[%s622_s1 + $0x90] sm:$0xff]  ;;  %v34_v50 = vld [vmem:[%s622_s1 + $0x88] sm:$0xff]  ;;  %v53_v51 = vld [vmem:[%s622_s1 + $0x120] sm:$0xff] }
  0x12   :  { %142 = vmatpush.msra.mxu0 %v24_v25  ;;  %180 = vmatpush.msra.mxu2 %v58_v31  ;;  %v71_v48 = vld [vmem:[%s622_s1 + $0x1b0] sm:$0xff]  ;;  %v70_v52 = vld [vmem:[%s622_s1 + $0x1a8] sm:$0xff]  ;;  %v17_v53 = vld [vmem:[%s622_s1] sm:$0xff] }
  0x13   :  { %162 = vmatpush.msra.mxu1 %v40_v26  ;;  %200 = vmatpush.msra.mxu3 %v74_v36  ;;  %v33_v54 = vld [vmem:[%s622_s1 + $0x80] sm:$0xff]  ;;  %v96_v56 = vld [vmem:[%s622_s1 + $0x278] sm:$0xff]  ;;  %v95_v60 = vld [vmem:[%s622_s1 + $0x270] sm:$0xff] }
  0x14   :  { %143 = vmatpush.msra.mxu0 %v23_v29  ;;  %181 = vmatpush.msra.mxu2 %v57_v35  ;;  %v15_v55 = vld [vmem:[%s621_s0] sm:$0xff]  ;;  %v112_v57 = vld [vmem:[%s622_s1 + $0x2f8] sm:$0xff]  ;;  %v111_v61 = vld [vmem:[%s622_s1 + $0x2f0] sm:$0xff] }
  0x15   :  { %163 = vmatpush.msra.mxu1 %v39_v30  ;;  %201 = vmatpush.msra.mxu3 %v73_v40  ;;  %119 = vst [vmem:[#allocation1] ss:$4 sm:$0xff] %v15_v55  ;;  %v52_v58 = vld [vmem:[%s622_s1 + $0x118] sm:$0xff]  ;;  %v69_v59 = vld [vmem:[%s622_s1 + $0x1a0] sm:$0xff]  ;;  %v51_v62 = vld [vmem:[%s622_s1 + $0x110] sm:$0xff] }
  0x16   :  { %144 = vmatpush.msra.mxu0 %v22_v33  ;;  %182 = vmatpush.msra.mxu2 %v56_v39  ;;  %v68_v63 = vld [vmem:[%s622_s1 + $0x198] sm:$0xff]  ;;  %v16_v0 = vld [vmem:[%s621_s0 + $0x8] sm:$0xf] }
  0x17   :  { %164 = vmatpush.msra.mxu1 %v38_v34  ;;  %202 = vmatpush.msra.mxu3 %v72_v44  ;;  %v94_v1 = vld [vmem:[%s622_s1 + $0x268] sm:$0xff]  ;;  %121 = vst [vmem:[#allocation1 + $0x20] ss:$4 sm:$0xff] %v16_v0 }
  0x18   :  { %145 = vmatpush.msra.mxu0 %v21_v37  ;;  %183 = vmatpush.msra.mxu2 %v55_v43  ;;  %v110_v2 = vld [vmem:[%s622_s1 + $0x2e8] sm:$0xff] }
  0x19   :  { %165 = vmatpush.msra.mxu1 %v37_v38  ;;  %203 = vmatpush.msra.mxu3 %v71_v48 }
  0x1a   :  { %146 = vmatpush.msra.mxu0 %v20_v41  ;;  %184 = vmatpush.msra.mxu2 %v54_v47 }
  0x1b   :  { %166 = vmatpush.msra.mxu1 %v36_v42  ;;  %204 = vmatpush.msra.mxu3 %v70_v52 }
  0x1c   :  { %147 = vmatpush.msra.mxu0 %v19_v45  ;;  %185 = vmatpush.msra.mxu2 %v53_v51 }
  0x1d   :  { %167 = vmatpush.msra.mxu1 %v35_v46  ;;  %205 = vmatpush.msra.mxu3 %v69_v59 }
  0x1e   :  { %148 = vmatpush.msra.mxu0 %v18_v49  ;;  %186 = vmatpush.msra.mxu2 %v52_v58 }
  0x1f   :  { %168 = vmatpush.msra.mxu1 %v34_v50 }
  0x20   :  { %149 = vmatpush.msra.mxu0 %v17_v53 }
  0x21   :  { %169 = vmatpush.msra.mxu1 %v33_v54 }
  0x22   :  { %214 = vmatpush.msrb.mxu0 %v96_v56 }
  0x23   :  { %234 = vmatpush.msrb.mxu1 %v112_v57 }
  0x24   :  { %8 = vsyncpa [#allocation3], 0  ;;  %215 = vmatpush.msrb.mxu0 %v95_v60  ;;  %v50_v3 = vld [vmem:[%s622_s1 + $0x108] sm:$0xff]  ;;  %v67_v4 = vld [vmem:[%s622_s1 + $0x190] sm:$0xff]  ;;  %187 = vmatpush.msra.mxu2 %v51_v62  ;;  %s263_s21 = sshll.u32 %s624_s3, 4  ;;  %vm254_vm0 = vcmask 254976   ;;  %s264_s21 = int_to_ptr.hbm [resolvable:$true] %s263_s21 }
  0x25   :  { %235 = vmatpush.msrb.mxu1 %v111_v61  ;;  %v93_v5 = vld [vmem:[%s622_s1 + $0x260] sm:$0xff]  ;;  %206 = vmatpush.msra.mxu3 %v68_v63  ;;  %v66_v8 = vld [vmem:[%s622_s1 + $0x188] sm:$0xff]  ;;  %v92_v9 = vld [vmem:[%s622_s1 + $0x258] sm:$0xff] }
  0x26   :  { %v109_v6 = vld [vmem:[%s622_s1 + $0x2e0] sm:$0xff]  ;;  %216 = vmatpush.msrb.mxu0 %v94_v1  ;;  %v108_v10 = vld [vmem:[%s622_s1 + $0x2d8] sm:$0xff]  ;;  %188 = vmatpush.msra.mxu2 %v50_v3  ;;  %v124_v11 = vld.sshfl [vmem:[#allocation1 + $0x10] sm:$0xff pattern:$0x73625140] }
  0x27   :  { %236 = vmatpush.msrb.mxu1 %v110_v2  ;;  %v49_v7 = vld [vmem:[%s622_s1 + $0x100] sm:$0xff]  ;;  %207 = vmatpush.msra.mxu3 %v67_v4  ;;  %v91_v13 = vld [vmem:[%s622_s1 + $0x250] sm:$0xff]  ;;  %v125_v16 = vld.sshfl [vmem:[#allocation1 + $0x18] sm:$0xff pattern:$0x73625140] }
  0x28   :  { %217 = vmatpush.msrb.mxu0 %v93_v5  ;;  %v65_v12 = vld [vmem:[%s622_s1 + $0x180] sm:$0xff]  ;;  %v107_v14 = vld [vmem:[%s622_s1 + $0x2d0] sm:$0xff]  ;;  %189 = vmatpush.msra.mxu2 %v49_v7  ;;  %v90_v17 = vld [vmem:[%s622_s1 + $0x248] sm:$0xff] }
  0x29   :  { %237 = vmatpush.msrb.mxu1 %v109_v6  ;;  %208 = vmatpush.msra.mxu3 %v66_v8  ;;  %v122_v15 = vld.sshfl [vmem:[#allocation1] sm:$0xff pattern:$0x73625140]  ;;  %v106_v18 = vld [vmem:[%s622_s1 + $0x2c8] sm:$0xff]  ;;  %v88_v22 = vld [vmem:[%s622_s1 + $0x238] sm:$0xff] }
  0x2a   :  { %218 = vmatpush.msrb.mxu0 %v92_v9  ;;  %190 = vmatmul.f32.vlgmr.msra.gmra.mxu2 %v124_v11  ;;  %v123_v19 = vld.sshfl [vmem:[#allocation1 + $0x8] sm:$0xff pattern:$0x73625140]  ;;  %v89_v20 = vld [vmem:[%s622_s1 + $0x240] sm:$0xff]  ;;  %v104_v23 = vld [vmem:[%s622_s1 + $0x2b8] sm:$0xff] }
  0x2b   :  { %238 = vmatpush.msrb.mxu1 %v108_v10  ;;  %209 = vmatpush.msra.mxu3 %v65_v12  ;;  %v105_v21 = vld [vmem:[%s622_s1 + $0x2c0] sm:$0xff]  ;;  %v87_v24 = vld [vmem:[%s622_s1 + $0x230] sm:$0xff]  ;;  %v86_v26 = vld [vmem:[%s622_s1 + $0x228] sm:$0xff] }
  0x2c   :  { %219 = vmatpush.msrb.mxu0 %v91_v13  ;;  %210 = vmatmul.f32.vlgmr.msra.gmra.mxu3 %v125_v16  ;;  %v103_v25 = vld [vmem:[%s622_s1 + $0x2b0] sm:$0xff]  ;;  %v102_v27 = vld [vmem:[%s622_s1 + $0x2a8] sm:$0xff]  ;;  %v85_v28 = vld [vmem:[%s622_s1 + $0x220] sm:$0xff] }
  0x2d   :  { %239 = vmatpush.msrb.mxu1 %v107_v14  ;;  %150 = vmatmul.f32.vlgmr.msra.gmra.mxu0 %v122_v15  ;;  %v101_v29 = vld [vmem:[%s622_s1 + $0x2a0] sm:$0xff]  ;;  %v84_v30 = vld [vmem:[%s622_s1 + $0x218] sm:$0xff]  ;;  %v83_v32 = vld [vmem:[%s622_s1 + $0x210] sm:$0xff] }
  0x2e   :  { %220 = vmatpush.msrb.mxu0 %v90_v17  ;;  %170 = vmatmul.f32.vlgmr.msra.gmra.mxu1 %v123_v19  ;;  %v100_v31 = vld [vmem:[%s622_s1 + $0x298] sm:$0xff]  ;;  %v99_v33 = vld [vmem:[%s622_s1 + $0x290] sm:$0xff]  ;;  %v82_v34 = vld [vmem:[%s622_s1 + $0x208] sm:$0xff] }
  0x2f   :  { %240 = vmatpush.msrb.mxu1 %v106_v18  ;;  %v98_v35 = vld [vmem:[%s622_s1 + $0x288] sm:$0xff]  ;;  %v81_v36 = vld [vmem:[%s622_s1 + $0x200] sm:$0xff] }
  0x30   :  { %221 = vmatpush.msrb.mxu0 %v89_v20  ;;  %v97_v37 = vld [vmem:[%s622_s1 + $0x280] sm:$0xff]  ;;  %v127_v39 = vld.sshfl [vmem:[#allocation1 + $0x28] sm:$0xff pattern:$0x73625140]  ;;  %s300_s1 = smov [#allocation2]  }
  0x31   :  { %241 = vmatpush.msrb.mxu1 %v105_v21  ;;  %v126_v38 = vld.sshfl [vmem:[#allocation1 + $0x20] sm:$0xff pattern:$0x73625140]  ;;  %s261_s18 = sshll.u32 %s300_s1, 4  ;;  %s262_s18 = int_to_ptr.vmem [resolvable:$true] %s261_s18 }
  0x32   :  { %222 = vmatpush.msrb.mxu0 %v88_v22  ;;  %v273_v40 = vld [vmem:[%s623_s2] ss:$0 sm:$0xff] }
  0x33   :  { %242 = vmatpush.msrb.mxu1 %v104_v23 }
  0x34   :  { %223 = vmatpush.msrb.mxu0 %v87_v24 }
  0x35   :  { %243 = vmatpush.msrb.mxu1 %v103_v25 }
  0x36   :  { %224 = vmatpush.msrb.mxu0 %v86_v26 }
  0x37   :  { %244 = vmatpush.msrb.mxu1 %v102_v27 }
  0x38   :  { %225 = vmatpush.msrb.mxu0 %v85_v28 }
  0x39   :  { %245 = vmatpush.msrb.mxu1 %v101_v29 }
  0x3a   :  { %226 = vmatpush.msrb.mxu0 %v84_v30 }
  0x3b   :  { %246 = vmatpush.msrb.mxu1 %v100_v31 }
  0x3c   :  { %227 = vmatpush.msrb.mxu0 %v83_v32 }
  0x3d   :  { %247 = vmatpush.msrb.mxu1 %v99_v33 }
  0x3e   :  { %228 = vmatpush.msrb.mxu0 %v82_v34 }
  0x3f   :  { %248 = vmatpush.msrb.mxu1 %v98_v35 }
  0x40   :  { %229 = vmatpush.msrb.mxu0 %v81_v36 }
  0x41   :  { %249 = vmatpush.msrb.mxu1 %v97_v37  ;;  %230 = vmatmul.f32.vlgmr.msrb.gmra.mxu0 %v126_v38 }
  0x42   :  { %250 = vmatmul.f32.vlgmr.msrb.gmra.mxu1 %v127_v39 }
  0xaa   :  { %v151_v41 = vpop.f32.mrf.mxu0 }
  0xab   :  { %v152_v42 = vadd.f32 %v273_v40, %v151_v41  ;;  %v171_v43 = vpop.f32.mrf.mxu1 }
  0xad   :  { %v172_v44 = vadd.f32 %v171_v43, %v152_v42  ;;  %v191_v45 = vpop.f32.mrf.mxu2 }
  0xaf   :  { %v192_v46 = vadd.f32 %v191_v45, %v172_v44  ;;  %v211_v47 = vpop.f32.mrf.mxu3 }
  0xb1   :  { %v212_v48 = vadd.f32 %v211_v47, %v192_v46 }
  0xbe   :  { %v231_v49 = vpop.f32.mrf.mxu0 }
  0xbf   :  { %v251_v50 = vpop.f32.mrf.mxu1  ;;  %v232_v51 = vadd.f32 %v231_v49, %v212_v48 }
  0xc1   :  { %v252_v52 = vadd.f32 %v251_v50, %v232_v51 }
  0xc3   :  { %255 = vst.msk [vmem:[#allocation2] sm:$0x3] %vm254_vm0, %v252_v52 }
  0xc4   :  { %266 = dma.vmem_to_hbm [thread:$0]  %s262_s18, 32, %s264_s21, [#allocation3]  }
  0xc5   :  { %298 = dma.done.wait [#allocation3], 32  }
  0xc6   :  { %299 = vsyncadd [#allocation3], 4294967264 }
  0xc7   :  { %271 = vsyncpa [#allocation3], 1 }

</bundles_post_ra>
